<compile_context>
chip_gen: v7x
topology: tpu7x:2x2x1
jax: 0.10.0
libtpu: 0.0.40
codegen_flags: <defaults>
</compile_context>

<pallas_src>
import jax
import jax.numpy as jnp
from jax.experimental import pallas as pl
from jax.experimental.pallas import tpu as pltpu


# ----------------------------------------------------------------------------
# Kernels
# ----------------------------------------------------------------------------
def _adapter_fuse_kernel(x_ref, h_ref,
                         w1, b1, w2, b2, w3, b3, w4, b4, wf_ref, bf_ref,
                         out_ref, acc_ref):
    """Grid = (token_tiles, states_num). One hidden state / fuse-weight slice per step."""
    s = pl.program_id(1)
    bf16 = jnp.bfloat16

    @pl.when(s == 0)
    def _mlp_and_residual():
        x = x_ref[...]

        def lin_relu(a, w_r, b_r):
            # bf16 operands on the MXU, f32 accumulation, f32 bias + ReLU on the VPU.
            y = jnp.dot(a.astype(bf16), w_r[...],
                        preferred_element_type=jnp.float32) + b_r[...]
            return jnp.maximum(y, 0.0)

        o = lin_relu(x, w1, b1)
        o = lin_relu(o, w2, b2)
        o = lin_relu(o, w3, b3)
        o = lin_relu(o, w4, b4)
        acc_ref[...] = o + x.astype(jnp.float32) + bf_ref[...]

    # Per-state K-slice of the fuse projection: acc += h_s @ wf[s]
    # (accumulation stays on the MXU result path via the f32 VMEM accumulator).
    acc_ref[...] += jnp.dot(h_ref[...].astype(bf16), wf_ref[...],
                            preferred_element_type=jnp.float32)

    @pl.when(s == pl.num_programs(1) - 1)
    def _writeback():
        out_ref[...] = acc_ref[...].astype(out_ref.dtype)


def _adapter_nofuse_kernel(x_ref, w1, b1, w2, b2, w3, b3, w4, b4, out_ref):
    bf16 = jnp.bfloat16
    x = x_ref[...]

    def lin_relu(a, w_r, b_r):
        y = jnp.dot(a.astype(bf16), w_r[...],
                    preferred_element_type=jnp.float32) + b_r[...]
        return jnp.maximum(y, 0.0)

    o = lin_relu(x, w1, b1)
    o = lin_relu(o, w2, b2)
    o = lin_relu(o, w3, b3)
    o = lin_relu(o, w4, b4)
    out_ref[...] = (o + x.astype(jnp.float32)).astype(out_ref.dtype)


# ----------------------------------------------------------------------------
# One-time parameter preparation (hoisted out of the per-call path)
# ----------------------------------------------------------------------------
def prepare_adapter_params(params, states_num=13):
    """Cast matmul weights to bf16 once, reshape the fuse projection into per-state
    (D, D) slices and biases into (1, out) rows.  Reuse the result across forwards."""
    w1, b1, w2, b2, w3, b3, w4, b4, wf, bf = params
    D = w1.shape[0]
    as_bf16 = lambda w: w.astype(jnp.bfloat16)
    row_f32 = lambda b: b.reshape(1, -1).astype(jnp.float32)
    return dict(
        w1=as_bf16(w1), b1=row_f32(b1),
        w2=as_bf16(w2), b2=row_f32(b2),
        w3=as_bf16(w3), b3=row_f32(b3),
        w4=as_bf16(w4), b4=row_f32(b4),
        wf=as_bf16(wf).reshape(states_num, D, D),   # per-state K slices of fuse weight
        bf=row_f32(bf),
    )


# ----------------------------------------------------------------------------
# VMEM-aware sizing
# ----------------------------------------------------------------------------
def _vmem_limit_bytes():
    try:
        cap = int(pltpu.get_tpu_info().vmem_capacity_bytes)
    except Exception:
        cap = 64 << 20                      # conservative: assume v7x-sized VMEM
    return int(min((cap * 3) // 4, 96 << 20))   # fallback path -> 48 MiB, never full VMEM


def _auto_tm(T, D, x_itemsize, h_itemsize, out_itemsize, resident_bytes,
             use_fuse, vmem_limit):
    # Per-row VMEM cost of the double-buffered streaming tiles (+ f32 accumulator).
    per_row = 2 * D * x_itemsize + 2 * D * out_itemsize
    if use_fuse:
        per_row += 2 * D * h_itemsize + 4 * D
    budget = vmem_limit - resident_bytes - (4 << 20)     # headroom for internal scratch
    tm = budget // max(per_row, 1)
    tm = int(max(8, min(1024, (tm // 8) * 8)))
    return tm


# ----------------------------------------------------------------------------
# Forward wrapper
# ----------------------------------------------------------------------------
def adapter_forward(x, hidden_states, prepared_params, *,
                    hidden_vision_fuse=True, tm=None):
    """x: (B, S, D).  hidden_states: stacked (states_num, B, S, D) array (preferred)
    or a list of (B, S, D) arrays (a list costs one extra HBM stack pass).
    Activations may be f32 or bf16 — the kernel casts matmul operands itself; no
    wrapper-side cast pass is added."""
    B, S, D = x.shape
    T = B * S
    p = prepared_params
    out_dtype = x.dtype

    x2 = x.reshape(T, D)

    if hidden_vision_fuse:
        if isinstance(hidden_states, (list, tuple)):
            # TODO(synk): upstream producers should emit the stacked layout directly;
            # this stack is one extra HBM pass over the hidden states.
            hidden_states = jnp.stack(hidden_states, axis=0)
        states_num = hidden_states.shape[0]
        h3 = hidden_states.reshape(states_num, T, D)
        assert p["wf"].shape == (states_num, D, D)
        h_itemsize = h3.dtype.itemsize
    else:
        states_num = 0
        h3 = None
        h_itemsize = 0

    # Resident (single-buffered) weight bytes + the streamed (D, D) fuse slice (x2 bufs).
    resident = sum(int(p[k].size) * p[k].dtype.itemsize
                   for k in ("w1", "b1", "w2", "b2", "w3", "b3", "w4", "b4"))
    if hidden_vision_fuse:
        resident += int(p["bf"].size) * p["bf"].dtype.itemsize
        resident += 2 * D * D * 2

    vmem_limit = _vmem_limit_bytes()

    # ---- token tile size ----------------------------------------------------
    if tm is None:
        tm = _auto_tm(T, D, x2.dtype.itemsize, h_itemsize, x2.dtype.itemsize,
                      resident, hidden_vision_fuse, vmem_limit)
    tm = int(tm)
    if tm >= T:
        tm = T                                # one block == full token axis (always legal)
    else:
        tm = max(8, (tm // 8) * 8)            # sublane granularity; partial last block OK
    grid_t = pl.cdiv(T, tm)

    # ---- BlockSpecs ----------------------------------------------------------
    buffered = getattr(pl, "Buffered", None)

    def resident_spec(shape):
        idx = lambda *_: (0,) * len(shape)
        if buffered is not None:
            try:
                return pl.BlockSpec(shape, idx, pipeline_mode=buffered(1))
            except TypeError:                 # only the pipeline_mode kwarg fallback
                pass
        return pl.BlockSpec(shape, idx)

    if hidden_vision_fuse:
        in_specs = [
            pl.BlockSpec((tm, D), lambda i, s: (i, 0)),             # x token tile
            pl.BlockSpec((None, tm, D), lambda i, s: (s, i, 0)),    # hidden state s tile
            resident_spec(p["w1"].shape), resident_spec(p["b1"].shape),
            resident_spec(p["w2"].shape), resident_spec(p["b2"].shape),
            resident_spec(p["w3"].shape), resident_spec(p["b3"].shape),
            resident_spec(p["w4"].shape), resident_spec(p["b4"].shape),
            pl.BlockSpec((None, D, D), lambda i, s: (s, 0, 0)),     # fuse weight slice s
            resident_spec(p["bf"].shape),
        ]
        out_specs = pl.BlockSpec((tm, D), lambda i, s: (i, 0))
        grid = (grid_t, states_num)
        scratch = [pltpu.VMEM((tm, D), jnp.float32)]
        dim_sem = ("parallel", "arbitrary")
        kernel = _adapter_fuse_kernel
        inputs = (x2, h3, p["w1"], p["b1"], p["w2"], p["b2"],
                  p["w3"], p["b3"], p["w4"], p["b4"], p["wf"], p["bf"])
    else:
        in_specs = [
            pl.BlockSpec((tm, D), lambda i: (i, 0)),
            resident_spec(p["w1"].shape), resident_spec(p["b1"].shape),
            resident_spec(p["w2"].shape), resident_spec(p["b2"].shape),
            resident_spec(p["w3"].shape), resident_spec(p["b3"].shape),
            resident_spec(p["w4"].shape), resident_spec(p["b4"].shape),
        ]
        out_specs = pl.BlockSpec((tm, D), lambda i: (i, 0))
        grid = (grid_t,)
        scratch = []
        dim_sem = ("parallel",)
        kernel = _adapter_nofuse_kernel
        inputs = (x2, p["w1"], p["b1"], p["w2"], p["b2"],
                  p["w3"], p["b3"], p["w4"], p["b4"])

    out2 = pl.pallas_call(
        kernel,
        out_shape=jax.ShapeDtypeStruct((T, D), out_dtype),
        grid_spec=pltpu.PrefetchScalarGridSpec(
            num_scalar_prefetch=0,
            grid=grid,
            in_specs=in_specs,
            out_specs=out_specs,
            scratch_shapes=scratch,
        ),
        compiler_params=pltpu.CompilerParams(
            dimension_semantics=dim_sem,
            vmem_limit_bytes=vmem_limit,
        ),
    )(*inputs)

    return out2.reshape(B, S, D)


# ----------------------------------------------------------------------------
# Parameters & reference
# ----------------------------------------------------------------------------
def init_params(key, input_dim, base_dim, states_num=13, dtype=jnp.float32):
    """Deterministic synthetic parameters (PyTorch-Linear fan-in init, stored transposed)."""
    dims = [
        (input_dim, base_dim * 4),            # adapt1
        (base_dim * 4, base_dim),             # adapt2
        (base_dim, base_dim * 8),             # adapt3
        (base_dim * 8, input_dim),            # adapt4
        (states_num * input_dim, input_dim),  # fuse.project
    ]
    params = []
    for (fan_in, fan_out) in dims:
        key, kw, kb = jax.random.split(key, 3)
        bound = 1.0 / (fan_in ** 0.5)
        w = jax.random.uniform(kw, (fan_in, fan_out), dtype, -bound, bound)
        b = jax.random.uniform(kb, (fan_out,), dtype, -bound, bound)
        params += [w, b]
    return tuple(params)


def adapter_reference(x, hidden_states, params, hidden_vision_fuse=True):
    (w1, b1, w2, b2, w3, b3, w4, b4, wf, bf) = params
    relu = lambda t: jnp.maximum(t, 0.0)
    o = relu(x @ w1 + b1)
    o = relu(o @ w2 + b2)
    o = relu(o @ w3 + b3)
    o = relu(o @ w4 + b4)
    if hidden_vision_fuse:
        h = jnp.concatenate(hidden_states, axis=-1)
        return o + x + (h @ wf + bf)
    return o + x


if __name__ == "__main__":
    key = jax.random.PRNGKey(0)

    B, S = 2, 8              # 16 tokens
    input_dim = 128          # lane-dense output; adapt widths: 128 -> 128 -> 32 -> 256 -> 128
    base_dim = 32
    states_num = 13

    kp, kx, kh = jax.random.split(key, 3)
    params = init_params(kp, input_dim, base_dim, states_num)
    prepared = prepare_adapter_params(params, states_num=states_num)   # one-time prep

    x = jax.random.normal(kx, (B, S, input_dim), jnp.float32)
    # Hidden states already in the stacked (states_num, B, S, D) layout (no wrapper copy).
    h_all = jax.random.normal(kh, (states_num, B, S, input_dim), jnp.float32)

    # tm=8 -> grid (2, 13): exercises the pipelined token grid and the per-state K-split.
    out = adapter_forward(x, h_all, prepared, hidden_vision_fuse=True, tm=8)
    out = jax.block_until_ready(out)

    ref = adapter_reference(x, [h_all[i] for i in range(states_num)], params,
                            hidden_vision_fuse=True)
    assert out.shape == (B, S, input_dim)
    max_err = float(jnp.max(jnp.abs(out - ref)))
    # bf16 matmul operands with f32 accumulation vs full-f32 reference (intentional tradeoff).
    assert jnp.allclose(out, ref, atol=5e-2, rtol=5e-2), f"fuse mismatch (max err {max_err})"

    # Also exercise the hidden_vision_fuse=False path.
    out_nf = adapter_forward(x, None, prepared, hidden_vision_fuse=False, tm=8)
    out_nf = jax.block_until_ready(out_nf)
    ref_nf = adapter_reference(x, None, params, hidden_vision_fuse=False)
    max_err_nf = float(jnp.max(jnp.abs(out_nf - ref_nf)))
    assert jnp.allclose(out_nf, ref_nf, atol=5e-2, rtol=5e-2), \
        f"no-fuse mismatch (max err {max_err_nf})"

    print("KERNEL_OK")
</pallas_src>

<mosaic_0001>
module attributes {stable_mosaic.version = 11 : i64} {
  func.func @_adapter_fuse_kernel(%arg0: i32, %arg1: i32, %arg2: memref<8x128xf32, #tpu.memory_space<vmem>>, %arg3: memref<1x8x128xf32, #tpu.memory_space<vmem>>, %arg4: memref<128x128xbf16, #tpu.memory_space<vmem>>, %arg5: memref<1x128xf32, #tpu.memory_space<vmem>>, %arg6: memref<128x32xbf16, #tpu.memory_space<vmem>>, %arg7: memref<1x32xf32, #tpu.memory_space<vmem>>, %arg8: memref<32x256xbf16, #tpu.memory_space<vmem>>, %arg9: memref<1x256xf32, #tpu.memory_space<vmem>>, %arg10: memref<256x128xbf16, #tpu.memory_space<vmem>>, %arg11: memref<1x128xf32, #tpu.memory_space<vmem>>, %arg12: memref<1x128x128xbf16, #tpu.memory_space<vmem>>, %arg13: memref<1x128xf32, #tpu.memory_space<vmem>>, %arg14: memref<8x128xf32, #tpu.memory_space<vmem>>, %arg15: memref<8x128xf32, #tpu.memory_space<vmem>>) attributes {dimension_semantics = [#tpu.dimension_semantics<parallel>, #tpu.dimension_semantics<arbitrary>], iteration_bounds = array<i64: 2, 13>, scalar_prefetch = 0 : i64, scratch_operands = 1 : i64, tpu.core_type = #tpu.core_type<tc>, window_params = [{transform_indices = @transform_0, window_bounds = array<i64: 8, 128>}, {transform_indices = @transform_1, window_bounds = array<i64: 1, 8, 128>}, {pipeline_mode = #tpu.pipeline_mode<synchronous>, transform_indices = @transform_2, window_bounds = array<i64: 128, 128>}, {pipeline_mode = #tpu.pipeline_mode<synchronous>, transform_indices = @transform_3, window_bounds = array<i64: 1, 128>}, {pipeline_mode = #tpu.pipeline_mode<synchronous>, transform_indices = @transform_4, window_bounds = array<i64: 128, 32>}, {pipeline_mode = #tpu.pipeline_mode<synchronous>, transform_indices = @transform_5, window_bounds = array<i64: 1, 32>}, {pipeline_mode = #tpu.pipeline_mode<synchronous>, transform_indices = @transform_6, window_bounds = array<i64: 32, 256>}, {pipeline_mode = #tpu.pipeline_mode<synchronous>, transform_indices = @transform_7, window_bounds = array<i64: 1, 256>}, {pipeline_mode = #tpu.pipeline_mode<synchronous>, transform_indices = @transform_8, window_bounds = array<i64: 256, 128>}, {pipeline_mode = #tpu.pipeline_mode<synchronous>, transform_indices = @transform_9, window_bounds = array<i64: 1, 128>}, {transform_indices = @transform_10, window_bounds = array<i64: 1, 128, 128>}, {pipeline_mode = #tpu.pipeline_mode<synchronous>, transform_indices = @transform_11, window_bounds = array<i64: 1, 128>}, {transform_indices = @transform_12, window_bounds = array<i64: 8, 128>}]} {
    %c0_i32 = arith.constant 0 : i32
    %0 = arith.cmpi eq, %arg1, %c0_i32 : i32
    %1 = arith.extui %0 : i1 to i32
    %c0_i32_0 = arith.constant 0 : i32
    %2 = arith.cmpi ne, %1, %c0_i32_0 : i32
    scf.if %2 {
      %c0_11 = arith.constant 0 : index
      %c0_12 = arith.constant 0 : index
      %15 = vector.load %arg2[%c0_11, %c0_12] : memref<8x128xf32, #tpu.memory_space<vmem>>, vector<8x128xf32>
      %16 = arith.truncf %15 : vector<8x128xf32> to vector<8x128xbf16>
      %c0_13 = arith.constant 0 : index
      %c0_14 = arith.constant 0 : index
      %17 = vector.load %arg4[%c0_13, %c0_14] : memref<128x128xbf16, #tpu.memory_space<vmem>>, vector<128x128xbf16>
      %cst_15 = arith.constant dense<0.000000e+00> : vector<8x128xf32>
      %18 = tpu.matmul %16, %17, %cst_15 {dimension_numbers = #tpu.dot_dimension_numbers<[1], [0], [0], [1], [0, 0, 1, 1], [], []>} : vector<8x128xbf16>, vector<128x128xbf16>, vector<8x128xf32> -> vector<8x128xf32>
      %c0_16 = arith.constant 0 : index
      %c0_17 = arith.constant 0 : index
      %19 = vector.load %arg5[%c0_16, %c0_17] : memref<1x128xf32, #tpu.memory_space<vmem>>, vector<1x128xf32>
      %20 = vector.broadcast %19 : vector<1x128xf32> to vector<8x128xf32>
      %21 = arith.addf %18, %20 : vector<8x128xf32>
      %cst_18 = arith.constant 0.000000e+00 : f32
      %22 = vector.broadcast %cst_18 : f32 to vector<8x128xf32>
      %23 = arith.maximumf %21, %22 : vector<8x128xf32>
      %24 = arith.truncf %23 : vector<8x128xf32> to vector<8x128xbf16>
      %c0_19 = arith.constant 0 : index
      %c0_20 = arith.constant 0 : index
      %25 = vector.load %arg6[%c0_19, %c0_20] : memref<128x32xbf16, #tpu.memory_space<vmem>>, vector<128x32xbf16>
      %cst_21 = arith.constant dense<0.000000e+00> : vector<8x32xf32>
      %26 = tpu.matmul %24, %25, %cst_21 {dimension_numbers = #tpu.dot_dimension_numbers<[1], [0], [0], [1], [0, 0, 1, 1], [], []>} : vector<8x128xbf16>, vector<128x32xbf16>, vector<8x32xf32> -> vector<8x32xf32>
      %c0_22 = arith.constant 0 : index
      %c0_23 = arith.constant 0 : index
      %27 = vector.load %arg7[%c0_22, %c0_23] : memref<1x32xf32, #tpu.memory_space<vmem>>, vector<1x32xf32>
      %28 = vector.broadcast %27 : vector<1x32xf32> to vector<8x32xf32>
      %29 = arith.addf %26, %28 : vector<8x32xf32>
      %cst_24 = arith.constant 0.000000e+00 : f32
      %30 = vector.broadcast %cst_24 : f32 to vector<8x32xf32>
      %31 = arith.maximumf %29, %30 : vector<8x32xf32>
      %32 = arith.truncf %31 : vector<8x32xf32> to vector<8x32xbf16>
      %c0_25 = arith.constant 0 : index
      %c0_26 = arith.constant 0 : index
      %33 = vector.load %arg8[%c0_25, %c0_26] : memref<32x256xbf16, #tpu.memory_space<vmem>>, vector<32x256xbf16>
      %cst_27 = arith.constant dense<0.000000e+00> : vector<8x256xf32>
      %34 = tpu.matmul %32, %33, %cst_27 {dimension_numbers = #tpu.dot_dimension_numbers<[1], [0], [0], [1], [0, 0, 1, 1], [], []>} : vector<8x32xbf16>, vector<32x256xbf16>, vector<8x256xf32> -> vector<8x256xf32>
      %c0_28 = arith.constant 0 : index
      %c0_29 = arith.constant 0 : index
      %35 = vector.load %arg9[%c0_28, %c0_29] : memref<1x256xf32, #tpu.memory_space<vmem>>, vector<1x256xf32>
      %36 = vector.broadcast %35 : vector<1x256xf32> to vector<8x256xf32>
      %37 = arith.addf %34, %36 : vector<8x256xf32>
      %cst_30 = arith.constant 0.000000e+00 : f32
      %38 = vector.broadcast %cst_30 : f32 to vector<8x256xf32>
      %39 = arith.maximumf %37, %38 : vector<8x256xf32>
      %40 = arith.truncf %39 : vector<8x256xf32> to vector<8x256xbf16>
      %c0_31 = arith.constant 0 : index
      %c0_32 = arith.constant 0 : index
      %41 = vector.load %arg10[%c0_31, %c0_32] : memref<256x128xbf16, #tpu.memory_space<vmem>>, vector<256x128xbf16>
      %cst_33 = arith.constant dense<0.000000e+00> : vector<8x128xf32>
      %42 = tpu.matmul %40, %41, %cst_33 {dimension_numbers = #tpu.dot_dimension_numbers<[1], [0], [0], [1], [0, 0, 1, 1], [], []>} : vector<8x256xbf16>, vector<256x128xbf16>, vector<8x128xf32> -> vector<8x128xf32>
      %c0_34 = arith.constant 0 : index
      %c0_35 = arith.constant 0 : index
      %43 = vector.load %arg11[%c0_34, %c0_35] : memref<1x128xf32, #tpu.memory_space<vmem>>, vector<1x128xf32>
      %44 = vector.broadcast %43 : vector<1x128xf32> to vector<8x128xf32>
      %45 = arith.addf %42, %44 : vector<8x128xf32>
      %cst_36 = arith.constant 0.000000e+00 : f32
      %46 = vector.broadcast %cst_36 : f32 to vector<8x128xf32>
      %47 = arith.maximumf %45, %46 : vector<8x128xf32>
      %48 = arith.addf %47, %15 : vector<8x128xf32>
      %c0_37 = arith.constant 0 : index
      %c0_38 = arith.constant 0 : index
      %49 = vector.load %arg13[%c0_37, %c0_38] : memref<1x128xf32, #tpu.memory_space<vmem>>, vector<1x128xf32>
      %50 = vector.broadcast %49 : vector<1x128xf32> to vector<8x128xf32>
      %51 = arith.addf %48, %50 : vector<8x128xf32>
      %c0_39 = arith.constant 0 : index
      %c0_40 = arith.constant 0 : index
      %52 = vector.load %arg15[%c0_39, %c0_40] : memref<8x128xf32, #tpu.memory_space<vmem>>, vector<8x128xf32>
      tpu.vector_store %arg15[%c0_39, %c0_40], %51 {strides = array<i32>} : memref<8x128xf32, #tpu.memory_space<vmem>>, vector<8x128xf32>,
    } else {
    }
    %c0 = arith.constant 0 : index
    %c0_1 = arith.constant 0 : index
    %3 = vector.load %arg15[%c0, %c0_1] : memref<8x128xf32, #tpu.memory_space<vmem>>, vector<8x128xf32>
    %c0_2 = arith.constant 0 : index
    %c0_3 = arith.constant 0 : index
    %c0_4 = arith.constant 0 : index
    %4 = vector.load %arg3[%c0_2, %c0_3, %c0_4] : memref<1x8x128xf32, #tpu.memory_space<vmem>>, vector<1x8x128xf32>
    %5 = vector.shape_cast %4 : vector<1x8x128xf32> to vector<8x128xf32>
    %6 = arith.truncf %5 : vector<8x128xf32> to vector<8x128xbf16>
    %c0_5 = arith.constant 0 : index
    %c0_6 = arith.constant 0 : index
    %c0_7 = arith.constant 0 : index
    %7 = vector.load %arg12[%c0_5, %c0_6, %c0_7] : memref<1x128x128xbf16, #tpu.memory_space<vmem>>, vector<1x128x128xbf16>
    %8 = vector.shape_cast %7 : vector<1x128x128xbf16> to vector<128x128xbf16>
    %cst = arith.constant dense<0.000000e+00> : vector<8x128xf32>
    %9 = tpu.matmul %6, %8, %cst {dimension_numbers = #tpu.dot_dimension_numbers<[1], [0], [0], [1], [0, 0, 1, 1], [], []>} : vector<8x128xbf16>, vector<128x128xbf16>, vector<8x128xf32> -> vector<8x128xf32>
    %10 = arith.addf %3, %9 : vector<8x128xf32>
    %c0_8 = arith.constant 0 : index
    %c0_9 = arith.constant 0 : index
    %11 = vector.load %arg15[%c0_8, %c0_9] : memref<8x128xf32, #tpu.memory_space<vmem>>, vector<8x128xf32>
    tpu.vector_store %arg15[%c0_8, %c0_9], %10 {strides = array<i32>} : memref<8x128xf32, #tpu.memory_space<vmem>>, vector<8x128xf32>,
    %c12_i32 = arith.constant 12 : i32
    %12 = arith.cmpi eq, %arg1, %c12_i32 : i32
    %13 = arith.extui %12 : i1 to i32
    %c0_i32_10 = arith.constant 0 : i32
    %14 = arith.cmpi ne, %13, %c0_i32_10 : i32
    scf.if %14 {
      %c0_11 = arith.constant 0 : index
      %c0_12 = arith.constant 0 : index
      %15 = vector.load %arg15[%c0_11, %c0_12] : memref<8x128xf32, #tpu.memory_space<vmem>>, vector<8x128xf32>
      %c0_13 = arith.constant 0 : index
      %c0_14 = arith.constant 0 : index
      %16 = vector.load %arg14[%c0_13, %c0_14] : memref<8x128xf32, #tpu.memory_space<vmem>>, vector<8x128xf32>
      tpu.vector_store %arg14[%c0_13, %c0_14], %15 {strides = array<i32>} : memref<8x128xf32, #tpu.memory_space<vmem>>, vector<8x128xf32>,
    } else {
    }
    return
  }
  func.func @transform_0(%arg0: i32, %arg1: i32) -> (i32, i32) {
    %c0_i32 = arith.constant 0 : i32
    %c0_i32_0 = arith.constant 0 : i32
    return %arg0, %c0_i32 : i32, i32
  }
  func.func @transform_1(%arg0: i32, %arg1: i32) -> (i32, i32, i32) {
    %c0_i32 = arith.constant 0 : i32
    %c0_i32_0 = arith.constant 0 : i32
    return %arg1, %arg0, %c0_i32 : i32, i32, i32
  }
  func.func @transform_2(%arg0: i32, %arg1: i32) -> (i32, i32) {
    %c0_i32 = arith.constant 0 : i32
    %c0_i32_0 = arith.constant 0 : i32
    %c0_i32_1 = arith.constant 0 : i32
    return %c0_i32, %c0_i32_0 : i32, i32
  }
  func.func @transform_3(%arg0: i32, %arg1: i32) -> (i32, i32) {
    %c0_i32 = arith.constant 0 : i32
    %c0_i32_0 = arith.constant 0 : i32
    %c0_i32_1 = arith.constant 0 : i32
    return %c0_i32, %c0_i32_0 : i32, i32
  }
  func.func @transform_4(%arg0: i32, %arg1: i32) -> (i32, i32) {
    %c0_i32 = arith.constant 0 : i32
    %c0_i32_0 = arith.constant 0 : i32
    %c0_i32_1 = arith.constant 0 : i32
    return %c0_i32, %c0_i32_0 : i32, i32
  }
  func.func @transform_5(%arg0: i32, %arg1: i32) -> (i32, i32) {
    %c0_i32 = arith.constant 0 : i32
    %c0_i32_0 = arith.constant 0 : i32
    %c0_i32_1 = arith.constant 0 : i32
    return %c0_i32, %c0_i32_0 : i32, i32
  }
  func.func @transform_6(%arg0: i32, %arg1: i32) -> (i32, i32) {
    %c0_i32 = arith.constant 0 : i32
    %c0_i32_0 = arith.constant 0 : i32
    %c0_i32_1 = arith.constant 0 : i32
    return %c0_i32, %c0_i32_0 : i32, i32
  }
  func.func @transform_7(%arg0: i32, %arg1: i32) -> (i32, i32) {
    %c0_i32 = arith.constant 0 : i32
    %c0_i32_0 = arith.constant 0 : i32
    %c0_i32_1 = arith.constant 0 : i32
    return %c0_i32, %c0_i32_0 : i32, i32
  }
  func.func @transform_8(%arg0: i32, %arg1: i32) -> (i32, i32) {
    %c0_i32 = arith.constant 0 : i32
    %c0_i32_0 = arith.constant 0 : i32
    %c0_i32_1 = arith.constant 0 : i32
    return %c0_i32, %c0_i32_0 : i32, i32
  }
  func.func @transform_9(%arg0: i32, %arg1: i32) -> (i32, i32) {
    %c0_i32 = arith.constant 0 : i32
    %c0_i32_0 = arith.constant 0 : i32
    %c0_i32_1 = arith.constant 0 : i32
    return %c0_i32, %c0_i32_0 : i32, i32
  }
  func.func @transform_10(%arg0: i32, %arg1: i32) -> (i32, i32, i32) {
    %c0_i32 = arith.constant 0 : i32
    %c0_i32_0 = arith.constant 0 : i32
    %c0_i32_1 = arith.constant 0 : i32
    return %arg1, %c0_i32, %c0_i32_0 : i32, i32, i32
  }
  func.func @transform_11(%arg0: i32, %arg1: i32) -> (i32, i32) {
    %c0_i32 = arith.constant 0 : i32
    %c0_i32_0 = arith.constant 0 : i32
    %c0_i32_1 = arith.constant 0 : i32
    return %c0_i32, %c0_i32_0 : i32, i32
  }
  func.func @transform_12(%arg0: i32, %arg1: i32) -> (i32, i32) {
    %c0_i32 = arith.constant 0 : i32
    %c0_i32_0 = arith.constant 0 : i32
    return %arg0, %c0_i32 : i32, i32
  }
}

</mosaic_0001>

<bundles_post_ra>
// kernel: tpu_custom_call.1
= control target key start
LH: loop header
LB: loop body
LE: loop exit
PB: predicated region body
PF: predicated region fallthrough
CT: control target
= control target key end

     0   :  { %s2761_s0 = inlined_call_operand.hbm [shape: f32[16,128], index: 0, kind: input, shape index: {}]   ;;  %s2762_s1 = inlined_call_operand.hbm [shape: f32[13,16,128], index: 1, kind: input, shape index: {}]   ;;  %s2763_s2 = inlined_call_operand.vmem [shape: bf16[128,128], index: 2, kind: input, shape index: {}]   ;;  %s2764_s3 = inlined_call_operand.hbm [shape: f32[1,128], index: 3, kind: input, shape index: {}]   ;;  %s2765_s4 = inlined_call_operand.vmem [shape: bf16[128,32], index: 4, kind: input, shape index: {}]   ;;  %s2766_s5 = inlined_call_operand.hbm [shape: f32[1,32], index: 5, kind: input, shape index: {}]   ;;  %s2767_s6 = inlined_call_operand.vmem [shape: bf16[32,256], index: 6, kind: input, shape index: {}]   ;;  %s2768_s7 = inlined_call_operand.vmem [shape: f32[1,256], index: 7, kind: input, shape index: {}]   ;;  %s2769_s8 = inlined_call_operand.hbm [shape: bf16[256,128], index: 8, kind: input, shape index: {}]   ;;  %s2770_s9 = inlined_call_operand.vmem [shape: f32[1,128], index: 9, kind: input, shape index: {}]   ;;  %s2771_s10 = inlined_call_operand.hbm [shape: bf16[13,128,128], index: 10, kind: input, shape index: {}]   ;;  %s2772_s11 = inlined_call_operand.vmem [shape: f32[1,128], index: 11, kind: input, shape index: {}]   ;;  %s2773_s12 = inlined_call_operand.hbm [shape: f32[16,128], index: 12, kind: output, shape index: {}]  }
   0x1   :  { %2797 = sst [smem:[#allocation31_spill]] %s2761_s0 }
   0x2   :  { %2798 = sst [smem:[#allocation32_spill]] %s2762_s1 }
   0x3   :  { %2799 = sst [smem:[#allocation33_spill]] %s2763_s2 }
   0x4   :  { %2800 = sst [smem:[#allocation34_spill]] %s2764_s3 }
   0x5   :  { %2801 = sst [smem:[#allocation35_spill]] %s2765_s4 }
   0x6   :  { %2802 = sst [smem:[#allocation36_spill]] %s2766_s5 }
   0x7   :  { %2803 = sst [smem:[#allocation37_spill]] %s2767_s6 }
   0x8   :  { %2804 = sst [smem:[#allocation38_spill]] %s2768_s7 }
   0x9   :  { %2805 = sst [smem:[#allocation39_spill]] %s2769_s8 }
   0xa   :  { %2806 = sst [smem:[#allocation40_spill]] %s2770_s9 }
   0xb   :  { %2807 = sst [smem:[#allocation41_spill]] %s2771_s10 }
   0xc   :  { %2808 = sst [smem:[#allocation42_spill]] %s2772_s11 }
   0xd   :  { %2809 = sst [smem:[#allocation43_spill]] %s2773_s12 }
   0xe   :  { %17 = vsyncpa [#allocation4], 0 }
   0xf   :  { %19 = vsyncpa [#allocation4 + $0x1], 0 }
  0x10   :  { %20 = vsyncpa [#allocation7], 0 }
  0x11   :  { %22 = vsyncpa [#allocation7 + $0x1], 0 }
  0x12   :  { %23 = vsyncpa [#allocation10], 0 }
  0x13   :  { %24 = vsyncpa [#allocation13], 0 }
  0x14   :  { %26 = vsyncpa [#allocation13 + $0x1], 0 }
  0x15   :  { %27 = vsyncpa [#allocation5], 0 }
  0x16   :  { %29 = vsyncpa [#allocation5 + $0x1], 0  ;;  %s2176_s21 = smov 0   ;;  %s2178_s22 = smov 0  }
  0x17   :  { %s2180_s23 = smov 0   ;;  %s2182_s24 = smov 0  }
  0x18   :  { %s2184_s25 = smov 0   ;;  %s2186_s26 = smov 0  }
  0x19   :  { %s2188_s27 = smov 0   ;;  %s2190_s28 = smov 0  }
  0x1a   :  { %s2192_s29 = smov 0   ;;  %s2194_s30 = smov 0  }
  0x1b   :  { %s2196_s13 = smov 0   ;;  %s2198_s14 = smov 0  }
  0x1c   :  { %s2200_s15 = smov 0   ;;  %s2202_s16 = smov 0  }
  0x1d LB: > { %2810 = sst [smem:[#allocation21_spill]] %s2043_s21  ;;  %s2247_s17 = sadd.s32 4294967295, %s2095_s16   ;;  %s2095_s16 = sphi %s2202_s16, %s35_s16   ;;  %s2091_s15 = sphi %s2200_s15, %s2893_s15   ;;  %s2087_s14 = sphi %s2198_s14, %s2892_s14   ;;  %s2083_s13 = sphi %s2196_s13, %s2891_s13   ;;  %s2079_s30 = sphi %s2194_s30, %s2890_s30   ;;  %s2075_s29 = sphi %s2192_s29, %s2889_s29   ;;  %s2071_s28 = sphi %s2190_s28, %s2888_s28   ;;  %s2067_s27 = sphi %s2188_s27, %s2887_s27   ;;  %s2063_s26 = sphi %s2186_s26, %s2886_s26   ;;  %s2059_s25 = sphi %s2184_s25, %s2885_s25   ;;  %s2055_s24 = sphi %s2182_s24, %s2878_s24   ;;  %s2051_s23 = sphi %s2180_s23, %s2884_s23   ;;  %s2047_s22 = sphi %s2178_s22, %s2883_s22   ;;  %s2043_s21 = sphi %s2176_s21, %s2882_s21  }
  0x1e   : > { %2811 = sst [smem:[#allocation22_spill]] %s2059_s25  ;;  %p1353_p0 = scmp.ge.s32.totalorder %s2095_s16, 1 }
  0x1f   : > { %2812 = sst [smem:[#allocation23_spill]] %s2067_s27  ;;  %p2779_p1 = scmp.eq.s32.totalorder %s2247_s17, 0 }
  0x20   : > { %2813 = sst [smem:[#allocation24_spill]] %s2079_s30  ;;  %p347_p2 = scmp.lt.s32.totalorder %s2095_s16, 27 }
  0x21   : > { %2814 = sst [smem:[#allocation25_spill]] %s2083_s13  ;;  %s2097_s19 = smov [#allocation8]  }
  0x22   : > { %p2252_p3 = pnand %p1353_p0, %p347_p2  ;;  %s363_s20 = sshll.u32 %s2097_s19, 4  ;;  %s364_s20 = int_to_ptr.vmem [resolvable:$true] %s363_s20 }
  0x23   : > { %s2098_s12 = smov [#allocation9]   ;;  %s2099_s9 = smov [#allocation11]  }
  0x24   : > { %s2815_s18 = scalar_select %p2252_p3, 1, 0 }
  0x25   : > { %p1559_p4 = pneg %p2252_p3  ;;  %s377_s13 = sshll.u32 %s2098_s12, 4  ;;  %s2264_s13 = int_to_ptr.vmem [resolvable:$true] %s377_s13 }
  0x26   : > { %2816 = sst [smem:[#allocation26_spill]] %s2815_s18  ;;  %s393_s7 = sshll.u32 %s2099_s9, 4  ;;  %s2266_s7 = int_to_ptr.vmem [resolvable:$true] %s393_s7 }
  0x27   : > { %p2260_p5 = pnand %p1559_p4, %p2779_p1  ;;  %s2818_s3 = sld [smem:[#allocation34_spill]] }
  0x29   : > { %p2276_p7 = pneg %p2260_p5 }
  0x2d   : > { %s1759_s19 = scalar_lea.hbm %s2818_s3, 16 }
  0x2e   : > { %p1760_p6 = scmp.ne.s32.totalorder %s2818_s3, %s1759_s19  ;;  %p1766_p10 = scmp.lt.u32.totalorder %s1759_s19, %s2818_s3 }
  0x30   : > { %p1762_p8 = pnand %p2276_p7, %p1760_p6 }
  0x32   : > { %p1763_p9 = pneg %p1762_p8 }
  0x34   : > { %p1768_p11 = pnand %p1766_p10, %p1763_p9 }
  0x36   : > { %1771 = shalt.err (!%p1768_p11)
}
  0x37   : > { %s1772_s4 = scalar_lea.vmem %s364_s20, 16  ;;  %s1779_s2 = scalar_lea.vmem %s364_s20, 32 }
  0x38   : > { %p1773_p12 = scmp.ne.s32.totalorder %s364_s20, %s1772_s4  ;;  %p1780_p2 = scmp.lt.s32.totalorder %s364_s20, %s364_s20 }
  0x39   : > { %p1781_p4 = scmp.lt.s32.totalorder %s1779_s2, %s1772_s4 }
  0x3a   : > { %p1775_p13 = pnand %p1773_p12, %p2276_p7 }
  0x3b   : > { %p1782_p1 = por %p1781_p4, %p1780_p2 }
  0x3c   : > { %p1776_p0 = pneg %p1775_p13 }
  0x3e   : > { %p1783_p3 = pnand %p1782_p1, %p1776_p0 }
  0x40   : > { %1786 = shalt.err (!%p1783_p3)
}
  0x41   : > { %1562 = dma.hbm_to_vmem [thread:$0]  (!%p2260_p5), %s2818_s3, 16, %s364_s20, [#allocation7]  }
  0x42   : > { %s2820_s5 = sld [smem:[#allocation36_spill]] }
  0x48   : > { %s1787_s9 = scalar_lea.hbm %s2820_s5, 16 }
  0x49   : > { %p1788_p6 = scmp.ne.s32.totalorder %s2820_s5, %s1787_s9  ;;  %p1794_p1 = scmp.lt.u32.totalorder %s1787_s9, %s2820_s5 }
  0x4b   : > { %p1790_p8 = pnand %p1788_p6, %p2276_p7 }
  0x4d   : > { %p1791_p9 = pneg %p1790_p8 }
  0x4f   : > { %p1796_p3 = pnand %p1794_p1, %p1791_p9 }
  0x51   : > { %1799 = shalt.err (!%p1796_p3)
}
  0x52   : > { %s1800_s20 = scalar_lea.vmem %s2264_s13, 16  ;;  %s1807_s10 = scalar_lea.vmem %s2264_s13, 32 }
  0x53   : > { %p1801_p10 = scmp.ne.s32.totalorder %s2264_s13, %s1800_s20  ;;  %p1808_p13 = scmp.lt.s32.totalorder %s2264_s13, %s2264_s13 }
  0x54   : > { %p1809_p0 = scmp.lt.s32.totalorder %s1807_s10, %s1800_s20 }
  0x55   : > { %p1803_p11 = pnand %p1801_p10, %p2276_p7 }
  0x56   : > { %p1810_p2 = por %p1809_p0, %p1808_p13 }
  0x57   : > { %p1804_p12 = pneg %p1803_p11 }
  0x59   : > { %p1811_p4 = pnand %p1810_p2, %p1804_p12 }
  0x5b   : > { %1814 = shalt.err (!%p1811_p4)
}
  0x5c   : > { %1565 = dma.hbm_to_vmem [thread:$0]  (!%p2260_p5), %s2820_s5, 16, %s2264_s13, [#allocation10]  }
  0x5d   : > { %s2821_s8 = sld [smem:[#allocation39_spill]] }
  0x63   : > { %s1815_s19 = scalar_lea.hbm %s2821_s8, 2048 }
  0x64   : > { %p1816_p6 = scmp.ne.s32.totalorder %s2821_s8, %s1815_s19  ;;  %p1822_p1 = scmp.lt.u32.totalorder %s1815_s19, %s2821_s8 }
  0x66   : > { %p1818_p8 = pnand %p1816_p6, %p2276_p7 }
  0x68   : > { %p1819_p9 = pneg %p1818_p8 }
  0x6a   : > { %p1824_p3 = pnand %p1822_p1, %p1819_p9 }
  0x6c   : > { %1827 = shalt.err (!%p1824_p3)
}
  0x6d   : > { %s1828_s13 = scalar_lea.vmem %s2266_s7, 2048  ;;  %p1836_p13 = scmp.lt.s32.totalorder %s2266_s7, %s2266_s7 }
  0x6e   : > { %p1829_p10 = scmp.ne.s32.totalorder %s2266_s7, %s1828_s13  ;;  %p1837_p0 = scmp.lt.s32.totalorder %s1828_s13, %s1828_s13 }
  0x70   : > { %p1831_p11 = pnand %p1829_p10, %p2276_p7  ;;  %p1838_p2 = por %p1837_p0, %p1836_p13 }
  0x72   : > { %p1832_p12 = pneg %p1831_p11 }
  0x74   : > { %p1839_p4 = pnand %p1838_p2, %p1832_p12 }
  0x76   : > { %1842 = shalt.err (!%p1839_p4)
}
  0x77   : > { %s2782_s10 = smov 64   ;;  %s2783_s12 = smov 4  }
  0x78   : > { %1568 = dma.hbm_to_vmem [thread:$0]  (!%p2260_p5), %s2821_s8, 2048, %s2266_s7, [#allocation10], %s2782_s10, %s2782_s10, %s2783_s12  }
  0x79   : > { %s1352_s30 = sadd.s32 4294967294, %s2095_s16   ;;  %p61_p7 = scmp.ne.s32.totalorder %s2075_s29, %s2071_s28 }
  0x7a   : > { %p2785_p6 = scmp.eq.s32.totalorder %s2095_s16, 0  ;;  %p67_p8 = scmp.ne.s32.totalorder %s2071_s28, %s2067_s27 }
  0x7b   : > { %p334_p9 = scmp.eq.s32.totalorder %s2247_s17, 25  ;;  %p340_p3 = scmp.eq.s32.totalorder %s1352_s30, 25 }
  0x7c   : > { %p63_p1 = por %p2785_p6, %p61_p7  ;;  %p2822_p10 = scmp.eq.s32.totalorder %s2247_s17, 0 }
  0x7d   : > { %p2359_p12 = por %p334_p9, %p61_p7  ;;  %p2363_p5 = por %p340_p3, %p67_p8 }
  0x7e   : > { %p2355_p11 = por %p2822_p10, %p67_p8  ;;  %p2784_p13 = scmp.lt.s32.totalorder %s2095_s16, 26 }
  0x7f   : > { %s2824_s9 = scalar_select %p2359_p12, 1, 0 }
  0x80   : > { %s2826_s7 = scalar_select %p2363_p5, 1, 0 }
  0x81   : > { %2825 = sst [smem:[#allocation27_spill]] %s2824_s9  ;;  %s413_s4 = sand.u32 1, %s2075_s29  }
  0x82   : > { %2827 = sst [smem:[#allocation28_spill]] %s2826_s7  ;;  %s1359_s2 = sshll.u32 %s2091_s15, 7 }
  0x83   : > { %s1358_s20 = sshll.u32 %s413_s4, 3  ;;  %s2828_s0 = sld [smem:[#allocation31_spill]] }
  0x84   : > { %s417_s30 = scalar_lea.vmem [#allocation3], %s1358_s20  ;;  %p2377_p0 = pnand %p2784_p13, %p63_p1 }
  0x85   : > { %s424_s10 = sshll.u32 %s417_s30, 4  ;;  %s414_s19 = scalar_lea.sflag [#allocation4], %s413_s4  ;;  %s2381_s10 = int_to_ptr.vmem [resolvable:$true] %s424_s10 }
  0x86   : > { %p1845_p4 = pneg %p2377_p0 }
  0x89   : > { %s2373_s6 = scalar_lea.hbm %s2828_s0, %s1359_s2  ;;  %s1848_s13 = scalar_lea.hbm %s2828_s0, 256 }
  0x8a   : > { %s1843_s18 = scalar_lea.hbm %s2373_s6, 128  ;;  %p1849_p9 = scmp.lt.u32.totalorder %s2373_s6, %s2828_s0 }
  0x8b   : > { %p1844_p2 = scmp.ne.s32.totalorder %s2373_s6, %s1843_s18  ;;  %p1850_p1 = scmp.lt.u32.totalorder %s1848_s13, %s1843_s18 }
  0x8c   : > { %p1852_p10 = scmp.lt.u32.totalorder %s1843_s18, %s2373_s6 }
  0x8d   : > { %p1846_p7 = pnand %p1845_p4, %p1844_p2  ;;  %p1851_p3 = por %p1850_p1, %p1849_p9 }
  0x8f   : > { %p1847_p8 = pneg %p1846_p7  ;;  %p1853_p13 = por %p1852_p10, %p1851_p3 }
  0x91   : > { %p1854_p6 = pnand %p1853_p13, %p1847_p8 }
  0x93   : > { %1857 = shalt.err (!%p1854_p6)
}
  0x94   : > { %s1858_s4 = scalar_lea.vmem %s2381_s10, 128  ;;  %s2102_s2 = smov [#allocation3]  }
  0x95   : > { %p1859_p2 = scmp.ne.s32.totalorder %s2381_s10, %s1858_s4  ;;  %s1863_s20 = sshll.u32 %s2102_s2, 4  ;;  %s1864_s20 = int_to_ptr.vmem [resolvable:$false] %s1863_s20 }
  0x96   : > { %s1865_s21 = scalar_lea.vmem %s1864_s20, 256  ;;  %p1866_p12 = scmp.lt.s32.totalorder %s2381_s10, %s1864_s20 }
  0x97   : > { %p1861_p7 = pnand %p1859_p2, %p1845_p4  ;;  %p1867_p9 = scmp.lt.s32.totalorder %s1865_s21, %s1858_s4 }
  0x99   : > { %p1862_p5 = pneg %p1861_p7  ;;  %p1868_p1 = por %p1867_p9, %p1866_p12 }
  0x9b   : > { %p1869_p3 = pnand %p1868_p1, %p1862_p5 }
  0x9d   : > { %1872 = shalt.err (!%p1869_p3)
}
  0x9e   : > { %1572 = dma.hbm_to_vmem [thread:$0]  (!%p2377_p0), %s2373_s6, 128, %s2381_s10, %s414_s19  }
  0x9f   : > { %s44_s18 = sadd.s32 1, %s2087_s14  ;;  %s82_s12 = sadd.s32 1, %s2063_s26 }
  0xa0   : > { %p45_p6 = scmp.ge.s32.totalorder %s44_s18, 13  ;;  %p89_p12 = scmp.ne.s32.totalorder %s2063_s26, %s2059_s25 }
  0xa1   : > { %p95_p5 = scmp.ne.s32.totalorder %s2059_s25, %s2055_s24  ;;  %s431_s13 = sand.u32 1, %s2095_s16  }
  0xa2   : > { %s2895_s18 = smov (%p45_p6, %s44_s18), 0  ;;  %s2831_s30 = sadd.s32 1, %s2091_s15 }
  0xa3   : > { %2830 = sst [smem:[#allocation29_spill]] %s2895_s18  ;;  %s2897_s30 = smov (!%p45_p6, %s2831_s30), %s2091_s15 }
  0xa4   : > { %s2422_s4 = ssub.s32 %s2087_s14, %s2895_s18  ;;  %p2832_p13 = scmp.eq.s32.totalorder %s2095_s16, 0 }
  0xa5   : > { %p49_p4 = scmp.ge.s32.totalorder %s2897_s30, 2  ;;  %p2834_p8 = scmp.eq.s32.totalorder %s2247_s17, 0 }
  0xa6   : > { %p2426_p0 = por %p89_p12, %p2832_p13  ;;  %s433_s19 = sand.u32 1, %s2063_s26  }
  0xa7   : > { %p2432_p10 = por %p95_p5, %p2834_p8  ;;  %s2899_s30 = smov (%p49_p4, %s2897_s30), 0 }
  0xa8   : > { %s1361_s6 = sshll.u32 %s2087_s14, 1  ;;  %s51_s2 = ssub.s32 %s2091_s15, %s2899_s30 }
  0xa9   : > { %s2835_s24 = scalar_select %p2432_p10, 1, 0 }
  0xaa   : > { %s1360_s20 = sshll.u32 %s433_s19, 3  ;;  %p52_p7 = scmp.eq.s32.totalorder %s51_s2, 0 }
  0xab   : > { %2836 = sst [smem:[#allocation30_spill]] %s2835_s24  ;;  %s79_s21 = sor.u32 %s2422_s4, %s51_s2 }
  0xac   : > { %p80_p9 = scmp.eq.s32.totalorder %s79_s21, 0  ;;  %s2837_s0 = sadd.s32 1, %s2075_s29 }
  0xad   : > { %s2447_s3 = scalar_select %p52_p7, %s2075_s29, %s2837_s0  }
  0xae   : > { %s2450_s5 = scalar_select %p80_p9, %s2063_s26, %s82_s12  }
  0xaf   : > { %s440_s8 = sadd.s32 %s2091_s15, %s1361_s6  ;;  %s435_s18 = scalar_lea.vmem [#allocation6], %s1360_s20 }
  0xb0   : > { %s444_s7 = sshll.u32 %s435_s18, 4  ;;  %s1362_s27 = sshll.u32 %s440_s8, 7  ;;  %s2453_s7 = int_to_ptr.vmem [resolvable:$true] %s444_s7 }
  0xb1   : > { %s2838_s1 = sld [smem:[#allocation32_spill]]  ;;  %p2839_p1 = scmp.lt.s32.totalorder %s2095_s16, 26 }
  0xb2   : > { %s432_s8 = scalar_lea.sflag [#allocation7], %s431_s13 }
  0xb3   : > { %p2464_p3 = pnand %p2839_p1, %p2426_p0 }
  0xb5   : > { %p1875_p12 = pneg %p2464_p3 }
  0xb7   : > { %s2458_s25 = scalar_lea.hbm %s2838_s1, %s1362_s27  ;;  %s1878_s12 = scalar_lea.hbm %s2838_s1, 3328 }
  0xb8   : > { %s1873_s18 = scalar_lea.hbm %s2458_s25, 128  ;;  %p1879_p0 = scmp.lt.u32.totalorder %s2458_s25, %s2838_s1 }
  0xb9   : > { %p1874_p6 = scmp.ne.s32.totalorder %s2458_s25, %s1873_s18  ;;  %p1880_p4 = scmp.lt.u32.totalorder %s1878_s12, %s1873_s18 }
  0xba   : > { %p1882_p7 = scmp.lt.u32.totalorder %s1873_s18, %s2458_s25 }
  0xbb   : > { %p1876_p5 = pnand %p1875_p12, %p1874_p6  ;;  %p1881_p8 = por %p1880_p4, %p1879_p0 }
  0xbd   : > { %p1877_p13 = pneg %p1876_p5  ;;  %p1883_p9 = por %p1882_p7, %p1881_p8 }
  0xbf   : > { %p1884_p1 = pnand %p1883_p9, %p1877_p13 }
  0xc1   : > { %1887 = shalt.err (!%p1884_p1)
}
  0xc2   : > { %s1888_s13 = scalar_lea.vmem %s2453_s7, 128  ;;  %s2103_s19 = smov [#allocation6]  }
  0xc3   : > { %p1889_p6 = scmp.ne.s32.totalorder %s2453_s7, %s1888_s13  ;;  %s1893_s6 = sshll.u32 %s2103_s19, 4  ;;  %s1894_s6 = int_to_ptr.vmem [resolvable:$false] %s1893_s6 }
  0xc4   : > { %s1895_s2 = scalar_lea.vmem %s1894_s6, 256  ;;  %p1896_p10 = scmp.lt.s32.totalorder %s2453_s7, %s1894_s6 }
  0xc5   : > { %p1891_p5 = pnand %p1889_p6, %p1875_p12  ;;  %p1897_p0 = scmp.lt.s32.totalorder %s1895_s2, %s1888_s13 }
  0xc7   : > { %p1892_p2 = pneg %p1891_p5  ;;  %p1898_p4 = por %p1897_p0, %p1896_p10 }
  0xc9   : > { %p1899_p8 = pnand %p1898_p4, %p1892_p2 }
  0xcb   : > { %1902 = shalt.err (!%p1899_p8)
}
  0xcc   : > { %s2841_s20 = sld [smem:[#allocation21_spill]]  ;;  %s276_s21 = sadd.s32 1, %s2051_s23 }
  0xcd   : > { %1575 = dma.hbm_to_vmem [thread:$0]  (!%p2464_p3), %s2458_s25, 128, %s2453_s7, %s432_s8  }
  0xce   : > { %p2842_p10 = scmp.eq.s32.totalorder %s2422_s4, 0  ;;  %p283_p2 = scmp.ne.s32.totalorder %s2051_s23, %s2047_s22 }
  0xcf   : > { %s451_s0 = sand.u32 1, %s2051_s23   ;;  %s1429_s27 = sshll.u32 %s2087_s14, 10 }
  0xd0   : > { %s2497_s18 = scalar_select %p2842_p10, %s2051_s23, %s276_s21  }
  0xd1   : > { %p2843_p13 = scmp.eq.s32.totalorder %s2095_s16, 0  ;;  %p2844_p9 = scmp.eq.s32.totalorder %s2247_s17, 0 }
  0xd2   : > { %p289_p12 = scmp.ne.s32.totalorder %s2047_s22, %s2841_s20  ;;  %s1363_s12 = sshll.u32 %s451_s0, 6 }
  0xd3   : > { %p285_p7 = por %p283_p2, %p2843_p13  ;;  %s2846_s13 = sld [smem:[#allocation41_spill]] }
  0xd4   : > { %p2509_p1 = por %p289_p12, %p2844_p9  ;;  %s455_s7 = scalar_lea.vmem [#allocation12], %s1363_s12 }
  0xd5   : > { %s462_s4 = sshll.u32 %s455_s7, 4  ;;  %p2848_p3 = scmp.lt.s32.totalorder %s2095_s16, 26  ;;  %s2524_s4 = int_to_ptr.vmem [resolvable:$true] %s462_s4 }
  0xd6   : > { %s2845_s9 = scalar_select %p2509_p1, 1, 0 }
  0xd7   : > { %p2520_p6 = pnand %p2848_p3, %p285_p7  ;;  %s2526_s6 = scalar_lea.sflag [#allocation13], %s451_s0 }
  0xd9   : > { %s2847_s19 = smov %s2846_s13  ;;  %s2516_s25 = scalar_lea.hbm %s2846_s13, %s1429_s27 }
  0xda   : > { %s1903_s2 = scalar_lea.hbm %s2516_s25, 1024  ;;  %p1905_p0 = pneg %p2520_p6 }
  0xdb   : > { %p1904_p5 = scmp.ne.s32.totalorder %s2516_s25, %s1903_s2  ;;  %s1908_s27 = scalar_lea.hbm %s2847_s19, 13312 }
  0xdc   : > { %p1909_p10 = scmp.lt.u32.totalorder %s2516_s25, %s2847_s19  ;;  %p1910_p2 = scmp.lt.u32.totalorder %s1908_s27, %s1903_s2 }
  0xdd   : > { %p1906_p4 = pnand %p1905_p0, %p1904_p5  ;;  %p1912_p13 = scmp.lt.u32.totalorder %s1903_s2, %s2516_s25 }
  0xde   : > { %p1911_p12 = por %p1910_p2, %p1909_p10 }
  0xdf   : > { %p1907_p8 = pneg %p1906_p4 }
  0xe0   : > { %p1913_p7 = por %p1912_p13, %p1911_p12 }
  0xe2   : > { %p1914_p9 = pnand %p1913_p7, %p1907_p8 }
  0xe4   : > { %1917 = shalt.err (!%p1914_p9)
}
  0xe5   : > { %s1918_s0 = scalar_lea.vmem %s2524_s4, 1024  ;;  %s2104_s24 = smov [#allocation12]  }
  0xe6   : > { %p1919_p3 = scmp.ne.s32.totalorder %s2524_s4, %s1918_s0  ;;  %s1923_s13 = sshll.u32 %s2104_s24, 4  ;;  %s1924_s13 = int_to_ptr.vmem [resolvable:$false] %s1923_s13 }
  0xe7   : > { %s1925_s7 = scalar_lea.vmem %s1924_s13, 2048  ;;  %p1926_p1 = scmp.lt.s32.totalorder %s2524_s4, %s1924_s13 }
  0xe8   : > { %p1921_p5 = pnand %p1919_p3, %p1905_p0  ;;  %p1927_p10 = scmp.lt.s32.totalorder %s1925_s7, %s1918_s0 }
  0xea   : > { %p1922_p4 = pneg %p1921_p5  ;;  %p1928_p2 = por %p1927_p10, %p1926_p1 }
  0xec   : > { %p1929_p12 = pnand %p1928_p2, %p1922_p4 }
  0xee   : > { %1932 = shalt.err (!%p1929_p12)
}
  0xef   : > { %s2850_s2 = smov 4   ;;  %s2851_s20 = smov 64  }
  0xf0   : > { %1578 = dma.hbm_to_vmem [thread:$0]  (!%p2520_p6), %s2516_s25, 1024, %s2524_s4, %s2526_s6, %s2851_s20, %s2851_s20, %s2850_s2  }
  0xf1   : > { %s2852_s21 = sld [smem:[#allocation26_spill]] }
  0xf7   : > { %p2853_p0 = scmp.ne.s32.totalorder %s2852_s21, 0 }
  0xf8   : > { %s2560_s27 = sand.u32 (!%p2853_p0), 1, %s2071_s28  }
  0xf9   : > { %474 = sbr.rel (%p2853_p0) target bundleno = 1485 (0x5cd), region = 68  ;;  %s1367_s12 = sshll.u32 (!%p2853_p0), %s2560_s27, 3 }
  0xfa   : > { %s477_s10 = scalar_lea.sflag (!%p2853_p0), [#allocation4], %s2560_s27  ;;  %s2564_s0 = scalar_lea.vmem (!%p2853_p0), [#allocation3], %s1367_s12 }
 0x100   : > { %2018 = dma.done.wait (%p2355_p11), %s477_s10, 128  }
 0x101   : > { %2020 = vsyncadd (%p2355_p11), %s477_s10, 4294967168  ;;  %s2854_s25 = sld [smem:[#allocation22_spill]]  ;;  %s2855_s4 = sld [smem:[#allocation30_spill]] }
 0x102   : > { %s485_s8 = sand.u32 1, %s2247_s17  }
 0x103   : > { %s486_s13 = scalar_lea.sflag [#allocation7], %s485_s8 }
 0x107   : > { %s487_s6 = sand.u32 1, %s2854_s25   ;;  %p2856_p1 = scmp.ne.s32.totalorder %s2855_s4, 0 }
 0x108   : > { %s2572_s24 = sshll.u32 %s487_s6, 3 }
 0x109   : > { %s489_s7 = scalar_lea.vmem [#allocation6], %s2572_s24 }
 0x10a   : > { %2022 = dma.done.wait (%p2856_p1), %s486_s13, 128  }
 0x10b   : > { %2024 = vsyncadd (%p2856_p1), %s486_s13, 4294967168  ;;  %p2857_p6 = scmp.eq.s32.totalorder %s2247_s17, 0 }
 0x10d   : > { %2026 = dma.done.wait (%p2857_p6), [#allocation7], 16   ;;  %p2858_p11 = pmov %p2857_p6 }
 0x10e   : > { %p2859_p8 = pmov %p2857_p6 }
 0x10f   : > { %2028 = vsyncadd (%p2858_p11), [#allocation7], 4294967280 }
 0x110   : > { %2030 = dma.done.wait (%p2859_p8), [#allocation10], 2064   ;;  %p2860_p13 = pmov %p2857_p6 }
 0x111   : > { %s506_s11 = sand.u32 1, %s2047_s22   ;;  %p2861_p7 = scmp.ne.s32.totalorder %s2845_s9, 0 }
 0x112   : > { %2032 = vsyncadd (%p2860_p13), [#allocation10], 4294965232  ;;  %s1372_s2 = sshll.u32 %s506_s11, 6  ;;  %s507_s20 = scalar_lea.sflag [#allocation13], %s506_s11 }
 0x113   : > { %s2588_s21 = scalar_lea.vmem [#allocation12], %s1372_s2 }
 0x114   : > { %2034 = dma.done.wait (%p2861_p7), %s507_s20, 1024  }
 0x115   : > { %2036 = vsyncadd (%p2861_p7), %s507_s20, 4294966272  ;;  %s2594_s10 = scalar_lea.vmem [#allocation14], %s1367_s12  ;;  %s2862_s25 = sld [smem:[#allocation24_spill]] }
 0x11b   : > { %p1374_p9 = scmp.ne.s32.totalorder %s2862_s25, 0 }
 0x11c   : > { %s2863_s8 = sld [smem:[#allocation33_spill]] (!%p1374_p9)  ;;  %v2105_v1 = vmov (!%p1374_p9), 0.0   ;;  %vm2106_vm0 = vmmov (!%p1374_p9), 0   ;;  %s2864_s20 = sld [smem:[#allocation35_spill]] (!%p1374_p9)  ;;  %v2637_v14 = vld [vmem:[%s2564_s0] sm:$0xff] (!%p1374_p9)  ;;  %v2107_v31 = vmov (!%p1374_p9), 0   ;;  %v800_v56 = vlaneseq (!%p1374_p9) }
 0x11d   : > { %565 = sbr.rel (%p1374_p9) target bundleno = 1202 (0x4b2), region = 96  ;;  %1479 = vmatprep.subr.bf16.mxu0 (!%p1374_p9), %v2105_v1  ;;  %1499 = vmatprep.subr.bf16.mxu1 (!%p1374_p9), %v2105_v1  ;;  %v567_v16 = vpack.c.bf16 (!%p1374_p9), %v2637_v14, %v2637_v14  ;;  %s2865_s11 = sld [smem:[#allocation37_spill]] (!%p1374_p9)  ;;  %v1375_v21 = vld [vmem:[#allocation8] ss:$0 sm:$0xff] (!%p1374_p9)  ;;  %v1735_v32 = vld [vmem:[#allocation11 + $0x40] sm:$0xff] (!%p1374_p9)   ;;  %v1737_v34 = vld [vmem:[#allocation11 + $0x48] sm:$0xff] (!%p1374_p9)  }
 0x11e   : > { %1495 = vmatprep.mubr.msk.bf16.mxu0 (!%p1374_p9), %vm2106_vm0, %v2105_v1  ;;  %1515 = vmatprep.mubr.msk.bf16.mxu1 (!%p1374_p9), %vm2106_vm0, %v2105_v1  ;;  %v1736_v33 = vld [vmem:[#allocation11] sm:$0xff] (!%p1374_p9)   ;;  %v1738_v35 = vld [vmem:[#allocation11 + $0x8] sm:$0xff] (!%p1374_p9)   ;;  %v1739_v36 = vld [vmem:[#allocation11 + $0x50] sm:$0xff] (!%p1374_p9)   ;;  %vm830_vm1 = vcmask (!%p1374_p9), 261120   ;;  %v801_v57 = vshrl.u32 (!%p1374_p9), %v800_v56, 7  ;;  %s2866_s12 = sld [smem:[#allocation38_spill]] (!%p1374_p9) }
 0x11f   : > { %v1740_v37 = vld [vmem:[#allocation11 + $0x10] sm:$0xff] (!%p1374_p9)   ;;  %v1741_v38 = vld [vmem:[#allocation11 + $0x58] sm:$0xff] (!%p1374_p9)   ;;  %v1743_v40 = vld [vmem:[#allocation11 + $0x60] sm:$0xff] (!%p1374_p9)   ;;  %s2867_s4 = sld [smem:[#allocation40_spill]] (!%p1374_p9)  ;;  %s2868_s0 = sld [smem:[#allocation42_spill]] (!%p1374_p9) }
 0x120   : > { %v1742_v39 = vld [vmem:[#allocation11 + $0x18] sm:$0xff] (!%p1374_p9)   ;;  %v1744_v41 = vld [vmem:[#allocation11 + $0x20] sm:$0xff] (!%p1374_p9)   ;;  %v1745_v42 = vld [vmem:[#allocation11 + $0x68] sm:$0xff] (!%p1374_p9)   ;;  %v802_v58 = vsub.s32 (!%p1374_p9), 0, %v801_v57  ;;  %v806_v60 = vsub.s32 (!%p1374_p9), 1, %v801_v57 }
 0x121   : > { %v1746_v43 = vld [vmem:[#allocation11 + $0x28] sm:$0xff] (!%p1374_p9)   ;;  %v1384_v44 = vld [vmem:[#allocation9] ss:$0 sm:$0xff] (!%p1374_p9)  ;;  %v1747_v52 = vld [vmem:[#allocation11 + $0x70] sm:$0xff] (!%p1374_p9)  }
 0x122   : > { %v1713_v0 = vld [vmem:[%s2863_s8] sm:$0xff] (!%p1374_p9)   ;;  %v1714_v2 = vld [vmem:[%s2863_s8 + $0x8] sm:$0xff] (!%p1374_p9)   ;;  %v1715_v3 = vld [vmem:[%s2863_s8 + $0x10] sm:$0xff] (!%p1374_p9)  }
 0x123   : > { %1480 = vmatpush3.bf16.msra.mxu0 (!%p1374_p9), %v1713_v0  ;;  %v1721_v4 = vld [vmem:[%s2864_s20] sm:$0xff] (!%p1374_p9)   ;;  %v1716_v5 = vld [vmem:[%s2863_s8 + $0x18] sm:$0xff] (!%p1374_p9)   ;;  %v1722_v6 = vld [vmem:[%s2864_s20 + $0x8] sm:$0xff] (!%p1374_p9)  }
 0x124   : > { %1481 = vmatprep.subr.bf16.mxu0 %v2105_v1  ;;  %1500 = vmatpush3.bf16.msra.mxu1 %v1721_v4  ;;  %v1717_v7 = vld [vmem:[%s2863_s8 + $0x20] sm:$0xff]   ;;  %v1723_v8 = vld [vmem:[%s2864_s20 + $0x10] sm:$0xff]   ;;  %v1718_v9 = vld [vmem:[%s2863_s8 + $0x28] sm:$0xff]  }
 0x125   : > { %1501 = vmatprep.subr.bf16.mxu1 %v2105_v1  ;;  %v1724_v10 = vld [vmem:[%s2864_s20 + $0x18] sm:$0xff]   ;;  %v1719_v11 = vld [vmem:[%s2863_s8 + $0x30] sm:$0xff]   ;;  %v1725_v12 = vld [vmem:[%s2864_s20 + $0x20] sm:$0xff]  }
 0x126   : > { %v1720_v13 = vld [vmem:[%s2863_s8 + $0x38] sm:$0xff]   ;;  %v1726_v15 = vld [vmem:[%s2864_s20 + $0x28] sm:$0xff]   ;;  %v1727_v17 = vld [vmem:[%s2864_s20 + $0x30] sm:$0xff]  }
 0x127   : > { %1482 = vmatpush3.bf16.msra.mxu0 %v1714_v2  ;;  %v1728_v18 = vld [vmem:[%s2864_s20 + $0x38] sm:$0xff]   ;;  %v1729_v19 = vld [vmem:[%s2865_s11] ss:$8 sps:$4 sm:$0xff]   ;;  %v1731_v20 = vld [vmem:[%s2865_s11 + $0x4] ss:$8 sps:$4 sm:$0xff]  }
 0x128   : > { %1483 = vmatprep.subr.bf16.mxu0 %v2105_v1  ;;  %1502 = vmatpush3.bf16.msra.mxu1 %v1722_v6  ;;  %v1734_v29 = vld [vmem:[%s2865_s11 + $0x14] ss:$8 sps:$4 sm:$0xff]   ;;  %v1732_v30 = vld [vmem:[%s2865_s11 + $0x10] ss:$8 sps:$4 sm:$0xff]   ;;  %v1749_v54 = vld [vmem:[#allocation11 + $0x78] sm:$0xff]  }
 0x129   : > { %1503 = vmatprep.subr.bf16.mxu1 %v2105_v1  ;;  %v1748_v53 = vld [vmem:[#allocation11 + $0x30] sm:$0xff]   ;;  %v1750_v55 = vld [vmem:[#allocation11 + $0x38] sm:$0xff]  }
 0x12a   : > { %v798_v59 = vld [vmem:[%s2866_s12] sm:$0x3] }
 0x12b   : > { %1484 = vmatpush3.bf16.msra.mxu0 %v1715_v3  ;;  %v803_v61 = vrot.slane %v798_v59, %v802_v58  ;;  %v807_v62 = vrot.slane %v798_v59, %v806_v60 }
 0x12c   : > { %1485 = vmatprep.subr.bf16.mxu0 %v2105_v1  ;;  %1504 = vmatpush3.bf16.msra.mxu1 %v1723_v8 }
 0x12d   : > { %1505 = vmatprep.subr.bf16.mxu1 %v2105_v1 }
 0x12f   : > { %1486 = vmatpush3.bf16.msra.mxu0 %v1716_v5 }
 0x130   : > { %1487 = vmatprep.subr.bf16.mxu0 %v2105_v1  ;;  %1506 = vmatpush3.bf16.msra.mxu1 %v1724_v10  ;;  %v1398_v10 = vld [vmem:[%s2867_s4] ss:$0 sm:$0xff] }
 0x131   : > { %1507 = vmatprep.subr.bf16.mxu1 %v2105_v1 }
 0x133   : > { %1488 = vmatpush3.bf16.msra.mxu0 %v1717_v7 }
 0x134   : > { %1489 = vmatprep.subr.bf16.mxu0 %v2105_v1  ;;  %1508 = vmatpush3.bf16.msra.mxu1 %v1725_v12 }
 0x135   : > { %1509 = vmatprep.subr.bf16.mxu1 %v2105_v1 }
 0x137   : > { %1490 = vmatpush3.bf16.msra.mxu0 %v1718_v9 }
 0x138   : > { %1491 = vmatprep.subr.bf16.mxu0 %v2105_v1  ;;  %1510 = vmatpush3.bf16.msra.mxu1 %v1726_v15 }
 0x139   : > { %1511 = vmatprep.subr.bf16.mxu1 %v2105_v1 }
 0x13b   : > { %1492 = vmatpush3.bf16.msra.mxu0 %v1719_v11 }
 0x13c   : > { %1493 = vmatprep.subr.bf16.mxu0 %v2105_v1  ;;  %1512 = vmatpush3.bf16.msra.mxu1 %v1727_v17 }
 0x13d   : > { %1513 = vmatprep.subr.bf16.mxu1 %v2105_v1 }
 0x13f   : > { %1494 = vmatpush3.bf16.msra.mxu0 %v1720_v13 }
 0x140   : > { %1514 = vmatpush3.bf16.msra.mxu1 %v1728_v18  ;;  %834 = vmatprep.subr.bf16.mxu0 %v1731_v20  ;;  %v1415_v18 = vld [vmem:[%s2868_s0] ss:$0 sm:$0xff] }
 0x141   : > { %1448 = vmatprep.subr.bf16.mxu1 %v1735_v32 }
 0x142   : > { %1496 = vmatmul.mubr.bf16.vlgmr.msra.gmra.mrb[0].mxu0 %v567_v16 }
 0x143   : > { %835 = vmatpush1.bf16.msra.mxu0 %v1729_v19  ;;  %866 = vmatprep.mubr.bf16.mxu0 %v2107_v31 }
 0x144   : > { %836 = vmatprep.subr.bf16.mxu0 %v1734_v29 }
 0x147   : > { %837 = vmatpush1.bf16.msra.mxu0 %v1732_v30 }
 0x215   : > { %v673_v22 = vpop.f32.mrb[0].mxu0 }
 0x216   : > { %v674_v23 = vadd.f32 %v1375_v21, %v673_v22  ;;  %v1497_v24 = vpop.f32.mrb[1].mxu0 }
 0x217   : > { %v676_v25 = vpop.f32.mrb[2].mxu0 }
 0x218   : > { %v679_v26 = vmax.f32 %v674_v23, 0.0  ;;  %v1498_v27 = vpop.f32.mrb[3].mxu0 }
 0x21a   : > { %v680_v28 = vpack.c.bf16 %v679_v26, %v679_v26 }
 0x21c   : > { %1516 = vmatmul.mubr.bf16.vlgmr.msra.gmra.mrb[0].mxu1 %v680_v28 }
 0x21d   : > { %1449 = vmatpush3.bf16.msra.mxu1 %v1736_v33 }
 0x21e   : > { %1450 = vmatprep.subr.bf16.mxu1 %v1737_v34 }
 0x221   : > { %1451 = vmatpush3.bf16.msra.mxu1 %v1738_v35 }
 0x222   : > { %1452 = vmatprep.subr.bf16.mxu1 %v1739_v36 }
 0x225   : > { %1453 = vmatpush3.bf16.msra.mxu1 %v1740_v37 }
 0x226   : > { %1454 = vmatprep.subr.bf16.mxu1 %v1741_v38 }
 0x229   : > { %1455 = vmatpush3.bf16.msra.mxu1 %v1742_v39 }
 0x22a   : > { %1456 = vmatprep.subr.bf16.mxu1 %v1743_v40 }
 0x22d   : > { %1457 = vmatpush3.bf16.msra.mxu1 %v1744_v41 }
 0x22e   : > { %1458 = vmatprep.subr.bf16.mxu1 %v1745_v42 }
 0x231   : > { %1459 = vmatpush3.bf16.msra.mxu1 %v1746_v43 }
 0x232   : > { %1460 = vmatprep.subr.bf16.mxu1 %v1747_v52 }
 0x235   : > { %1461 = vmatpush3.bf16.msra.mxu1 %v1748_v53 }
 0x236   : > { %1462 = vmatprep.subr.bf16.mxu1 %v1749_v54 }
 0x239   : > { %1463 = vmatpush3.bf16.msra.mxu1 %v1750_v55 }
 0x2ef   : > { %v786_v45 = vpop.f32.mrb[0].mxu1 }
 0x2f0   : > { %v787_v46 = vadd.f32 %v1384_v44, %v786_v45  ;;  %v1517_v47 = vpop.f32.mrb[1].mxu1 }
 0x2f1   : > { %v789_v48 = vpop.f32.mrb[2].mxu1 }
 0x2f2   : > { %v792_v49 = vmax.f32 %v787_v46, 0.0  ;;  %v1518_v50 = vpop.f32.mrb[3].mxu1 }
 0x2f4   : > { %v793_v51 = vpack.c.bf16 %v792_v49, %v792_v49 }
 0x2f6   : > { %1397 = vmatmul.mubr.msk.bf16.vlgmr.msra.gmra.mrb[4].mxu0 %vm830_vm1, %v793_v51 }
 0x3c9   : > { %v868_v63 = vpop.f32.mrb[4].mxu0 }
 0x3ca   : > { %v869_v0 = vadd.f32 %v868_v63, %v803_v61  ;;  %v870_v1 = vpop.f32.mrb[5].mxu0 }
 0x3cb   : > { %v871_v2 = vadd.f32 %v870_v1, %v807_v62  ;;  %v872_v3 = vpop.f32.mrb[6].mxu0 }
 0x3cc   : > { %v875_v4 = vmax.f32 %v869_v0, 0.0  ;;  %v873_v5 = vpop.f32.mrb[7].mxu0 }
 0x3cd   : > { %v876_v6 = vmax.f32 %v871_v2, 0.0 }
 0x3ce   : > { %v877_v8 = vpack.c.bf16 %v875_v4, %v875_v4 }
 0x3cf   : > { %v878_v7 = vpack.c.bf16 %v876_v6, %v876_v6 }
 0x3d1   : > { %1046 = vmatprep.mubr.bf16.mxu1 %v878_v7 }
 0x3d2   : > { %1047 = vmatmul.mubr.bf16.vlgmr.msra.gmra.mrb[4].mxu1 %v877_v8 }
 0x4a5   : > { %v1464_v9 = vpop.f32.mrb[4].mxu1 }
 0x4a6   : > { %v1465_v11 = vpop.f32.mrb[5].mxu1 }
 0x4a7   : > { %v1466_v12 = vadd.f32 %v1465_v11, %v1464_v9  ;;  %v1467_v13 = vpop.f32.mrb[6].mxu1 }
 0x4a8   : > { %v1468_v15 = vpop.f32.mrb[7].mxu1 }
 0x4a9   : > { %v1049_v16 = vadd.f32 %v1466_v12, %v1398_v10 }
 0x4ab   : > { %v1054_v17 = vmax.f32 %v1049_v16, 0.0 }
 0x4ad   : > { %v1055_v19 = vadd.f32 %v1054_v17, %v2637_v14 }
 0x4af   : > { %v1063_v20 = vadd.f32 %v1415_v18, %v1055_v19 }
 0x4b1   : > { %1064 = vst [vmem:[#allocation2] sm:$0xff] %v1063_v20 }
 0x4b2 PF: > { %v1751_v21 = vld [vmem:[%s2588_s21] sm:$0xff]   ;;  %v2108_v22 = vmov 0.0   ;;  %v1752_v23 = vld [vmem:[%s2588_s21 + $0x8] sm:$0xff]   ;;  %vm2109_vm2 = vmmov 0   ;;  %v1753_v14 = vld [vmem:[%s2588_s21 + $0x10] sm:$0xff]   ;;  %s2869_s13 = sld [smem:[#allocation24_spill]] }
 0x4b3   : > { %1519 = vmatprep.subr.bf16.mxu0 %v2108_v22  ;;  %1535 = vmatprep.mubr.msk.bf16.mxu0 %vm2109_vm2, %v2108_v22  ;;  %v1754_v24 = vld [vmem:[%s2588_s21 + $0x18] sm:$0xff]   ;;  %v1755_v25 = vld [vmem:[%s2588_s21 + $0x20] sm:$0xff]   ;;  %v1756_v26 = vld [vmem:[%s2588_s21 + $0x28] sm:$0xff]  }
 0x4b4   : > { %1520 = vmatpush3.bf16.msra.mxu0 %v1751_v21  ;;  %v1757_v27 = vld [vmem:[%s2588_s21 + $0x30] sm:$0xff]   ;;  %v1758_v28 = vld [vmem:[%s2588_s21 + $0x38] sm:$0xff]  }
 0x4b5   : > { %1521 = vmatprep.subr.bf16.mxu0 %v2108_v22  ;;  %v1066_v29 = vld [vmem:[%s489_s7] sm:$0xff] }
 0x4b6   : > { %v1067_v30 = vpack.c.bf16 %v1066_v29, %v1066_v29 }
 0x4b8   : > { %1522 = vmatpush3.bf16.msra.mxu0 %v1752_v23  ;;  %v1065_v31 = vld [vmem:[#allocation2] sm:$0xff]  ;;  %p1424_p3 = scmp.ne.s32.totalorder %s2869_s13, 12 }
 0x4b9   : > { %1523 = vmatprep.subr.bf16.mxu0 %v2108_v22 }
 0x4bc   : > { %1524 = vmatpush3.bf16.msra.mxu0 %v1753_v14 }
 0x4bd   : > { %1525 = vmatprep.subr.bf16.mxu0 %v2108_v22 }
 0x4c0   : > { %1526 = vmatpush3.bf16.msra.mxu0 %v1754_v24 }
 0x4c1   : > { %1527 = vmatprep.subr.bf16.mxu0 %v2108_v22 }
 0x4c4   : > { %1528 = vmatpush3.bf16.msra.mxu0 %v1755_v25 }
 0x4c5   : > { %1529 = vmatprep.subr.bf16.mxu0 %v2108_v22 }
 0x4c8   : > { %1530 = vmatpush3.bf16.msra.mxu0 %v1756_v26 }
 0x4c9   : > { %1531 = vmatprep.subr.bf16.mxu0 %v2108_v22 }
 0x4cc   : > { %1532 = vmatpush3.bf16.msra.mxu0 %v1757_v27 }
 0x4cd   : > { %1533 = vmatprep.subr.bf16.mxu0 %v2108_v22 }
 0x4d0   : > { %1534 = vmatpush3.bf16.msra.mxu0 %v1758_v28 }
 0x4d3   : > { %1536 = vmatmul.mubr.bf16.vlgmr.msra.gmra.mrb[0].mxu0 %v1067_v30 }
 0x5a3   : > { %1177 = sbr.rel (%p1424_p3) target bundleno = 1458 (0x5b2), region = 100 }
 0x5a6   : > { %v1166_v32 = vpop.f32.mrb[0].mxu0 }
 0x5a7   : > { %v1172_v33 = vadd.f32 %v1166_v32, %v1065_v31  ;;  %v1537_v34 = vpop.f32.mrb[1].mxu0 }
 0x5a8   : > { %v1169_v35 = vpop.f32.mrb[2].mxu0 }
 0x5a9   : > { %1173 = vst [vmem:[#allocation2] sm:$0xff] %v1172_v33  ;;  %v1538_v36 = vpop.f32.mrb[3].mxu0 }
 0x5b0   : > { %v1178_v37 = vld [vmem:[#allocation2] sm:$0xff] }
 0x5b1   : > { %1179 = vst [vmem:[%s2594_s10] sm:$0xff] %v1178_v37 }
 0x5b2 PF: > { %s2870_s24 = sld [smem:[#allocation25_spill]]  ;;  %s2871_s7 = sld [smem:[#allocation27_spill]] }
 0x5b3   : > { %s2872_s2 = sld [smem:[#allocation43_spill]]  ;;  %s1194_s4 = sshll.u32 %s2594_s10, 4  ;;  %s1195_s4 = int_to_ptr.vmem [resolvable:$true] %s1194_s4 }
 0x5b4   : > { %s1181_s17 = scalar_lea.sflag [#allocation5], %s2560_s27  ;;  %s1933_s6 = scalar_lea.vmem %s1195_s4, 128 }
 0x5b5   : > { %p1934_p5 = scmp.ne.s32.totalorder %s1195_s4, %s1933_s6  ;;  %s2110_s0 = smov [#allocation14]  }
 0x5b6   : > { %s1937_s13 = sshll.u32 %s2110_s0, 4  ;;  %s1938_s13 = int_to_ptr.vmem [resolvable:$false] %s1937_s13 }
 0x5b7   : > { %s1939_s1 = scalar_lea.vmem %s1938_s13, 256  ;;  %p1940_p12 = scmp.lt.s32.totalorder %s1195_s4, %s1938_s13 }
 0x5b8   : > { %s1426_s21 = sshll.u32 %s2870_s24, 7  ;;  %p2873_p4 = scmp.ne.s32.totalorder %s2871_s7, 0 }
 0x5b9   : > { %s2688_s25 = scalar_lea.hbm %s2872_s2, %s1426_s21  ;;  %p1941_p0 = scmp.lt.s32.totalorder %s1939_s1, %s1933_s6 }
 0x5ba   : > { %p1935_p10 = pnand %p1934_p5, %p2873_p4 }
 0x5bb   : > { %p1942_p1 = por %p1941_p0, %p1940_p12 }
 0x5bc   : > { %p1936_p2 = pneg %p1935_p10 }
 0x5be   : > { %p1943_p6 = pnand %p1942_p1, %p1936_p2 }
 0x5c0   : > { %1946 = shalt.err (!%p1943_p6)
}
 0x5c1   : > { %s1947_s27 = scalar_lea.hbm %s2688_s25, 128  ;;  %s1951_s21 = scalar_lea.hbm %s2872_s2, 256 }
 0x5c2   : > { %p1948_p11 = scmp.ne.s32.totalorder %s2688_s25, %s1947_s27  ;;  %p1952_p7 = scmp.lt.u32.totalorder %s2688_s25, %s2872_s2 }
 0x5c3   : > { %p1953_p9 = scmp.lt.u32.totalorder %s1951_s21, %s1947_s27  ;;  %p1955_p5 = scmp.lt.u32.totalorder %s1947_s27, %s2688_s25 }
 0x5c4   : > { %p1949_p8 = pnand %p1948_p11, %p2873_p4 }
 0x5c5   : > { %p1954_p3 = por %p1953_p9, %p1952_p7 }
 0x5c6   : > { %p1950_p13 = pneg %p1949_p8 }
 0x5c7   : > { %p1956_p10 = por %p1955_p5, %p1954_p3 }
 0x5c9   : > { %p1957_p2 = pnand %p1956_p10, %p1950_p13 }
 0x5cb   : > { %1960 = shalt.err (!%p1957_p2)
}
 0x5cc   : > { %1557 = dma.vmem_to_hbm [thread:$0]  (%p2873_p4), %s1195_s4, 128, %s2688_s25, %s1181_s17  }
 0x5cd PF: > { %s2874_s1 = sld [smem:[#allocation23_spill]]  ;;  %s2875_s6 = sld [smem:[#allocation28_spill]] }
 0x5ce   : > { %p1590_p12 = scmp.ge.s32.totalorder %s2095_s16, 2 }
 0x5d3   : > { %s1206_s0 = sand.u32 1, %s2874_s1   ;;  %p2876_p0 = scmp.ne.s32.totalorder %s2875_s6, 0 }
 0x5d4   : > { %s1207_s13 = scalar_lea.sflag [#allocation5], %s1206_s0 }
 0x5d5   : > { %p1580_p1 = pnand %p1590_p12, %p2876_p0 }
 0x5d7   : > { %2038 = dma.done.wait (!%p1580_p1), %s1207_s13, 128  }
 0x5d8   : > { %2040 = vsyncadd (!%p1580_p1), %s1207_s13, 4294967168  ;;  %s35_s16 = sadd.s32 1, %s2095_s16   ;;  %s2878_s24 = sld [smem:[#allocation22_spill]] }
 0x5d9   : > { %p2714_p6 = scmp.ge.s32.totalorder %s35_s16, 28   ;;  %s2879_s7 = sld [smem:[#allocation29_spill]] }
 0x5da   : > { %s2880_s4 = smov %s2899_s30  ;;  %s2882_s21 = smov %s2047_s22 }
 0x5db   : > { %s2883_s22 = smov %s2051_s23  ;;  %s2884_s23 = smov %s2497_s18 }
 0x5dc   : > { %s2885_s25 = smov %s2063_s26  ;;  %s2886_s26 = smov %s2450_s5 }
 0x5dd   : > { %s2887_s27 = smov %s2071_s28  ;;  %s2888_s28 = smov %s2075_s29 }
 0x5de   : > { %s2889_s29 = smov %s2447_s3  ;;  %s2890_s30 = smov %s2087_s14 }
 0x5df   : > { %s2891_s13 = smov %s2091_s15  ;;  %s2892_s14 = smov %s2879_s7 }
 0x5e0   : > { %s2893_s15 = smov %s2880_s4  ;;  %34 = sbr.rel (!%p2714_p6) target bundleno = 29 (0x1d), region = 159 }
 0x5e7   :  { %1212 = vsyncpa [#allocation4], 1 }
 0x5e8   :  { %1214 = vsyncpa [#allocation4 + $0x1], 1 }
 0x5e9   :  { %1215 = vsyncpa [#allocation7], 1 }
 0x5ea   :  { %1217 = vsyncpa [#allocation7 + $0x1], 1 }
 0x5eb   :  { %1218 = vsyncpa [#allocation10], 1 }
 0x5ec   :  { %1219 = vsyncpa [#allocation13], 1 }
 0x5ed   :  { %1221 = vsyncpa [#allocation13 + $0x1], 1 }
 0x5ee   :  { %1222 = vsyncpa [#allocation5], 1 }
 0x5ef   :  { %1224 = vsyncpa [#allocation5 + $0x1], 1 }

</bundles_post_ra>
